<compile_context>
chip_gen: v6e
topology: v6e:2x2x1
jax: 0.10.0
libtpu: 0.0.40
codegen_flags: <defaults>
</compile_context>

<pallas_src>
import jax
import jax.numpy as jnp
from jax.experimental import pallas as pl
from jax.experimental.pallas import tpu as pltpu


def _round_up(x, m):
    return ((x + m - 1) // m) * m


def _cdiv(a, b):
    return -(-a // b)


def _deconv_matmul_kernel(x_ref, w_ref, b_ref, o_ref):
    # x: (tm, Cin) block; w: (Cin, 4*Cout_pad) VMEM-resident; b: (1, 4*Cout_pad) f32;
    # o: (tm, 4*Cout_pad) in the compute dtype (bf16 default -> half the store bytes).
    acc = jnp.dot(x_ref[...], w_ref[...], preferred_element_type=jnp.float32)
    o_ref[...] = (acc + b_ref[...]).astype(o_ref.dtype)


def up_concat(inputs, down_outputs, weight, bias, *, tm=1024,
              compute_dtype=jnp.bfloat16, vmem_limit_bytes=None,
              extra_buffering=None):
    """UpConcat forward: ConvTranspose2d(k=2, s=2)(inputs) concatenated after
    down_outputs along channels.

    inputs:        (N, Cin, H, W)        NCHW
    down_outputs:  (N, Cd, 2H, 2W)       NCHW
    weight:        (Cin, Cout, 2, 2)     PyTorch ConvTranspose2d layout
    bias:          (Cout,)

    tm: requested row tile. Auto-shrunk so double-buffered blocks fit a 24 MiB
        budget (safe on v7x); on v5e/v6e feel free to pass tm=2048 and/or a
        larger vmem_limit_bytes (they have 128 MiB physical VMEM).
    compute_dtype: matmul operand AND kernel store dtype.  Default bf16 with
        f32 MXU accumulation (TPU-native); note f32 inputs are therefore
        rounded to bf16 for the GEMM — pass compute_dtype=jnp.float32 if full
        f32 deconv precision is required (doubles HBM traffic).
    vmem_limit_bytes: override the auto-derived scoped VMEM limit.
    extra_buffering: optional int; sets pipeline_mode=pl.Buffered(n) on the
        x / out BlockSpecs (sweep only if an xprof trace shows exposed DMA).
    """
    N, Cin, H, W = inputs.shape
    Nd, Cd, Hd, Wd = down_outputs.shape
    assert (Nd, Hd, Wd) == (N, 2 * H, 2 * W), (down_outputs.shape, inputs.shape)
    assert weight.shape[0] == Cin and weight.shape[2:] == (2, 2), weight.shape
    Cout = weight.shape[1]

    comp_bytes = jnp.dtype(compute_dtype).itemsize

    # Lane-dense output: Kw = 4*Cout_pad multiple of 128.  Pad to 64 (Kw
    # multiple of 256 -> full 256-wide MXU on v6e/v7x) only when compute-bound.
    cout_align = 64 if (Cin >= 512 and comp_bytes <= 2) else 32
    Cout_pad = _round_up(Cout, cout_align)
    Kw = 4 * Cout_pad

    # Activations NCHW -> (M, Cin), rows ordered (n, h, w); cast to compute dtype.
    # (Single fused XLA transpose+cast pass over the input; see TODO above.)
    M = N * H * W
    x2d = jnp.transpose(inputs, (0, 2, 3, 1)).reshape(M, Cin).astype(compute_dtype)

    # Weight (Cin, Cout, 2, 2) -> pad Cout -> (Cin, 2, 2, Cout_pad) -> (Cin, Kw),
    # column order (di, dj, co).
    w_p = jnp.pad(weight, ((0, 0), (0, Cout_pad - Cout), (0, 0), (0, 0)))
    w2d = jnp.transpose(w_p, (0, 2, 3, 1)).reshape(Cin, Kw).astype(compute_dtype)

    # Bias repeated per (di, dj) tap, kept in f32 for the accumulate/add.
    b_p = jnp.pad(bias.astype(jnp.float32), (0, Cout_pad - Cout))
    b2d = jnp.tile(b_p, 4).reshape(1, Kw)

    # --- Row tiling: fit VMEM budget, then balance the blocks. ---
    resident_bytes = Cin * Kw * comp_bytes + Kw * 4      # VMEM-resident weight + bias
    row_align = 16 if comp_bytes < 4 else 8

    def _blocks_bytes(t):   # double-buffered x block + out block
        return 2 * t * (Cin * comp_bytes + Kw * comp_bytes)

    tm_req = max(row_align, min(_round_up(tm, row_align), _round_up(M, row_align)))
    while tm_req > 256 and _blocks_bytes(tm_req) + resident_bytes > (24 << 20):
        tm_req = _round_up(tm_req // 2, row_align)

    num_blocks = _cdiv(M, tm_req)
    tm_eff = _round_up(_cdiv(M, num_blocks), row_align)   # balanced: waste < row_align rows/block
    M_pad = num_blocks * tm_eff
    if M_pad != M:
        x2d = jnp.pad(x2d, ((0, M_pad - M), (0, 0)))
    grid = (num_blocks,)

    if vmem_limit_bytes is None:
        need = _blocks_bytes(tm_eff) + resident_bytes
        vmem_limit_bytes = int(min(max(need + need // 2 + (4 << 20), 32 << 20), 64 << 20))

    cost = pl.CostEstimate(
        flops=2 * M_pad * Cin * Kw,
        transcendentals=0,
        bytes_accessed=(M_pad * Cin * comp_bytes + Cin * Kw * comp_bytes
                        + Kw * 4 + M_pad * Kw * comp_bytes),
    )

    def _spec(block_shape, index_map):
        if extra_buffering is None:
            return pl.BlockSpec(block_shape, index_map)
        return pl.BlockSpec(block_shape, index_map,
                            pipeline_mode=pl.Buffered(extra_buffering))

    out2d = pl.pallas_call(
        _deconv_matmul_kernel,
        out_shape=jax.ShapeDtypeStruct((M_pad, Kw), compute_dtype),
        grid=grid,
        in_specs=[
            _spec((tm_eff, Cin), lambda i: (i, 0)),
            # Grid-invariant weight / bias: whole-array VMEM residents,
            # not run through the double-buffered pipeline.
            pl.BlockSpec(memory_space=pltpu.MemorySpace.VMEM),
            pl.BlockSpec(memory_space=pltpu.MemorySpace.VMEM),
        ],
        out_specs=_spec((tm_eff, Kw), lambda i: (i, 0)),
        compiler_params=pltpu.CompilerParams(
            dimension_semantics=("parallel",),      # load-bearing on v7x (2 TCs)
            vmem_limit_bytes=vmem_limit_bytes,
        ),
        cost_estimate=cost,
    )(x2d, w2d, b2d)

    # (M_pad, 4*Cout_pad) -> drop padding -> (N, H, W, 2, 2, Cout) -> NCHW.
    # Stays bf16 through the transpose (half the bytes of the old f32 glue);
    # the single f32 upcast is fused into the concat below.
    up = out2d
    if M_pad != M:
        up = up[:M]
    up = up.reshape(N, H, W, 2, 2, Cout_pad)
    if Cout_pad != Cout:
        up = up[..., :Cout]
    up = up.transpose(0, 5, 1, 3, 2, 4).reshape(N, Cout, 2 * H, 2 * W)

    # torch.cat([down_outputs, outputs], dim=1)
    final_dtype = jnp.promote_types(inputs.dtype, down_outputs.dtype)
    return jnp.concatenate(
        [down_outputs.astype(final_dtype), up.astype(final_dtype)], axis=1)


def _deconv_ref(x, w, b):
    # Pure-JAX reference for ConvTranspose2d(k=2, s=2), NCHW.
    y = jnp.einsum("nihw,iodk->nohdwk", x, w)  # (N, Cout, H, 2, W, 2)
    N, Co, H, _, W, _ = y.shape
    return y.reshape(N, Co, 2 * H, 2 * W) + b[None, :, None, None]


if __name__ == "__main__":
    key = jax.random.PRNGKey(0)
    in_feat, out_feat = 8, 4
    N, H, W = 2, 8, 8

    k1, k2, k3, k4 = jax.random.split(key, 4)
    inputs = jax.random.normal(k1, (N, in_feat, H, W), dtype=jnp.float32)
    down_outputs = jax.random.normal(
        k2, (N, out_feat, 2 * H, 2 * W), dtype=jnp.float32
    )

    # Deterministic parameter init (PyTorch-style uniform(-s, s), s = 1/sqrt(fan))
    fan = in_feat * 2 * 2
    s = 1.0 / jnp.sqrt(jnp.float32(fan))
    weight = jax.random.uniform(
        k3, (in_feat, out_feat, 2, 2), minval=-s, maxval=s, dtype=jnp.float32
    )
    bias = jax.random.uniform(
        k4, (out_feat,), minval=-s, maxval=s, dtype=jnp.float32
    )

    out = jax.jit(up_concat)(inputs, down_outputs, weight, bias)
    out = jax.block_until_ready(out)

    # Reference mirrors the kernel's precision choices: bf16 matmul operands,
    # f32 accumulation, bf16 store of the deconv result, f32 final concat.
    xr = inputs.astype(jnp.bfloat16).astype(jnp.float32)
    wr = weight.astype(jnp.bfloat16).astype(jnp.float32)
    up_ref = _deconv_ref(xr, wr, bias).astype(jnp.bfloat16).astype(jnp.float32)
    ref = jnp.concatenate([down_outputs, up_ref], axis=1)

    assert out.shape == (N, out_feat + out_feat, 2 * H, 2 * W), out.shape
    assert out.dtype == jnp.float32, out.dtype
    # Down half is a pure copy -> must match exactly.
    assert bool(jnp.array_equal(out[:, :out_feat], down_outputs))
    err = float(jnp.max(jnp.abs(out - ref)))
    assert jnp.allclose(out, ref, atol=1e-2, rtol=1e-2), err

    print("KERNEL_OK")
</pallas_src>

<mosaic_0001>
module attributes {stable_mosaic.version = 11 : i64} {
  func.func @_deconv_matmul_kernel(%arg0: i32, %arg1: memref<128x8xbf16, #tpu.memory_space<vmem>>, %arg2: memref<8x128xbf16, #tpu.memory_space<vmem>>, %arg3: memref<1x128xf32, #tpu.memory_space<vmem>>, %arg4: memref<128x128xbf16, #tpu.memory_space<vmem>>) attributes {dimension_semantics = [#tpu.dimension_semantics<parallel>], iteration_bounds = array<i64: 1>, scalar_prefetch = 0 : i64, scratch_operands = 0 : i64, tpu.core_type = #tpu.core_type<tc>, window_params = [{transform_indices = @transform_0, window_bounds = array<i64: 128, 8>}, {pipeline_mode = #tpu.pipeline_mode<synchronous>, transform_indices = @transform_1, window_bounds = array<i64: 8, 128>}, {pipeline_mode = #tpu.pipeline_mode<synchronous>, transform_indices = @transform_2, window_bounds = array<i64: 1, 128>}, {transform_indices = @transform_3, window_bounds = array<i64: 128, 128>}]} {
    %c0 = arith.constant 0 : index
    %c0_0 = arith.constant 0 : index
    %0 = vector.load %arg1[%c0, %c0_0] : memref<128x8xbf16, #tpu.memory_space<vmem>>, vector<128x8xbf16>
    %c0_1 = arith.constant 0 : index
    %c0_2 = arith.constant 0 : index
    %1 = vector.load %arg2[%c0_1, %c0_2] : memref<8x128xbf16, #tpu.memory_space<vmem>>, vector<8x128xbf16>
    %cst = arith.constant dense<0.000000e+00> : vector<128x128xf32>
    %2 = tpu.matmul %0, %1, %cst {dimension_numbers = #tpu.dot_dimension_numbers<[1], [0], [0], [1], [0, 0, 1, 1], [], []>} : vector<128x8xbf16>, vector<8x128xbf16>, vector<128x128xf32> -> vector<128x128xf32>
    %c0_3 = arith.constant 0 : index
    %c0_4 = arith.constant 0 : index
    %3 = vector.load %arg3[%c0_3, %c0_4] : memref<1x128xf32, #tpu.memory_space<vmem>>, vector<1x128xf32>
    %4 = vector.broadcast %3 : vector<1x128xf32> to vector<128x128xf32>
    %5 = arith.addf %2, %4 : vector<128x128xf32>
    %6 = arith.truncf %5 : vector<128x128xf32> to vector<128x128xbf16>
    %c0_5 = arith.constant 0 : index
    %c0_6 = arith.constant 0 : index
    %7 = vector.load %arg4[%c0_5, %c0_6] : memref<128x128xbf16, #tpu.memory_space<vmem>>, vector<128x128xbf16>
    tpu.vector_store %arg4[%c0_5, %c0_6], %6 {strides = array<i32>} : memref<128x128xbf16, #tpu.memory_space<vmem>>, vector<128x128xbf16>,
    return
  }
  func.func @transform_0(%arg0: i32) -> (i32, i32) {
    %c0_i32 = arith.constant 0 : i32
    %c0_i32_0 = arith.constant 0 : i32
    return %arg0, %c0_i32 : i32, i32
  }
  func.func @transform_1(%arg0: i32) -> (i32, i32) {
    %c0_i32 = arith.constant 0 : i32
    %c0_i32_0 = arith.constant 0 : i32
    %c0_i32_1 = arith.constant 0 : i32
    return %c0_i32, %c0_i32_0 : i32, i32
  }
  func.func @transform_2(%arg0: i32) -> (i32, i32) {
    %c0_i32 = arith.constant 0 : i32
    %c0_i32_0 = arith.constant 0 : i32
    %c0_i32_1 = arith.constant 0 : i32
    return %c0_i32, %c0_i32_0 : i32, i32
  }
  func.func @transform_3(%arg0: i32) -> (i32, i32) {
    %c0_i32 = arith.constant 0 : i32
    %c0_i32_0 = arith.constant 0 : i32
    return %arg0, %c0_i32 : i32, i32
  }
}

</mosaic_0001>

<bundles_post_ra>
// kernel: tile.8
= control target key start
LH: loop header
LB: loop body
LE: loop exit
PB: predicated region body
PF: predicated region fallthrough
CT: control target
= control target key end

     0   :  { %s22_s0 = inlined_call_operand.vmem [shape: f32[32], index: 0, kind: input, shape index: {}]   ;;  %s23_s1 = inlined_call_operand.vmem [shape: f32[4,32], index: 1, kind: output, shape index: {}]  }
   0x1   :  { %v4_v0 = vld [vmem:[%s22_s0] ss:$0 sm:$0xff] }
   0x2   :  { %5 = vst [vmem:[%s23_s1] sm:$0xf] %v4_v0 }

// kernel: tile.9
= control target key start
LH: loop header
LB: loop body
LE: loop exit
PB: predicated region body
PF: predicated region fallthrough
CT: control target
= control target key end

     0   :  { %vm8_vm0 = vcmask 261120   ;;  %s40_s8 = smov 32   ;;  %s41_s9 = smov 64   ;;  %vm14_vm1 = vcmask 1048320   ;;  %vm20_vm2 = vcmask 785920   ;;  %vm26_vm3 = vcmask 523520   ;;  %s58_s0 = inlined_call_operand.vmem [shape: f32[4,32], index: 0, kind: input, shape index: {}]   ;;  %s59_s1 = inlined_call_operand.vmem [shape: f32[1,128], index: 1, kind: output, shape index: {}]  }
   0x1   :  { %v5_v0 = vld [vmem:[%s58_s0] sm:$0xf]  ;;  %s39_s0 = smov 96  }
   0x2   :  { %6 = vst [vmem:[#allocation1] sm:$0xf] %v5_v0 }
   0x9   :  { %v11_v1 = vld [vmem:[#allocation1 + $0x3] sm:$0x1]   ;;  %v23_v2 = vld [vmem:[#allocation1 + $0x1] sm:$0x1]   ;;  %v7_v3 = vld [vmem:[#allocation1] sm:$0x1]  }
   0xa   :  { %12 = vrot.lane.b32.xlu0 %v11_v1, %s39_s0  ;;  %24 = vrot.lane.b32.xlu1 %v23_v2, %s40_s8  ;;  %v17_v4 = vld [vmem:[#allocation1 + $0x2] sm:$0x1]   ;;  %9 = vst.msk [vmem:[#allocation0] sm:$0x1] %vm8_vm0, %v7_v3  }
   0xe   :  { %18 = vrot.lane.b32.xlu0 %v17_v4, %s41_s9 }
  0x7c   :  { %v13_v5 = vpop.permute.xlu0 %12   ;;  %v25_v6 = vpop.permute.xlu1 %24  }
  0x7d   :  { %15 = vst.msk [vmem:[#allocation0] sm:$0x1] %vm14_vm1, %v13_v5  }
  0x80   :  { %v19_v7 = vpop.permute.xlu0 %18  }
  0x81   :  { %21 = vst.msk [vmem:[#allocation0] sm:$0x1] %vm20_vm2, %v19_v7  }
  0x82   :  { %27 = vst.msk [vmem:[#allocation0] sm:$0x1] %vm26_vm3, %v25_v6  }
  0x89   :  { %v32_v8 = vld [vmem:[#allocation0] sm:$0x1] }
  0x8a   :  { %35 = vst [vmem:[%s59_s1] sm:$0x1] %v32_v8 }

// kernel: up_concat.1
= control target key start
LH: loop header
LB: loop body
LE: loop exit
PB: predicated region body
PF: predicated region fallthrough
CT: control target
= control target key end

     0   :  { %vm104_vm0 = vcmask 1043456   ;;  %vm79_vm1 = vcmask 64512   ;;  %s506_s1 = inlined_call_operand.vmem [shape: bf16[8,128], index: 1, kind: input, shape index: {}]   ;;  %s507_s0 = inlined_call_operand.vmem [shape: bf16[128,8], index: 0, kind: input, shape index: {}]   ;;  %s508_s2 = inlined_call_operand.vmem [shape: f32[1,128], index: 2, kind: input, shape index: {}]   ;;  %s509_s3 = inlined_call_operand.vmem [shape: bf16[128,128], index: 3, kind: output, shape index: {}]  }
   0x1   :  { %v31_v0 = vld [vmem:[%s506_s1] sm:$0xf]  ;;  %v418_v4 = vld [vmem:[%s507_s0 + $0x8] sm:$0xff]   ;;  %v420_v6 = vld [vmem:[%s507_s0 + $0x10] sm:$0xff]  }
   0x2   :  { %414 = vmatprep.subr.msk.bf16.mxu0 %vm104_vm0, %v31_v0  ;;  %415 = vmatprep.subr.msk.bf16.mxu1 %vm104_vm0, %v31_v0  ;;  %v106_v1 = vsel %vm104_vm0, %v31_v0, 0  ;;  %v416_v2 = vld [vmem:[%s507_s0] sm:$0xff]   ;;  %v419_v5 = vld [vmem:[%s507_s0 + $0x28] sm:$0xff]   ;;  %v421_v7 = vld [vmem:[%s507_s0 + $0x30] sm:$0xff]  }
   0x3   :  { %395 = vmatpush3.bf16.msra.mxu0 %v106_v1  ;;  %413 = vmatpush3.bf16.msra.mxu1 %v106_v1  ;;  %v417_v3 = vld [vmem:[%s507_s0 + $0x20] sm:$0xff]   ;;  %v422_v8 = vld [vmem:[%s507_s0 + $0x18] sm:$0xff]  }
   0x4   :  { %396 = vmatprep.mubr.msk.bf16.mxu0 %vm79_vm1, %v416_v2  ;;  %404 = vmatprep.mubr.msk.bf16.mxu1 %vm79_vm1, %v417_v3  ;;  %v423_v9 = vld [vmem:[%s507_s0 + $0x38] sm:$0xff]   ;;  %v289_v12 = vld [vmem:[%s508_s2] ss:$0 sm:$0xff] }
   0x6   :  { %397 = vmatmul.mubr.msk.bf16.vlgmr.msra.gmra.mxu0 %vm79_vm1, %v418_v4  ;;  %405 = vmatmul.mubr.msk.bf16.vlgmr.msra.gmra.mxu1 %vm79_vm1, %v419_v5 }
   0x7   :  { %400 = vmatprep.mubr.msk.bf16.mxu0 %vm79_vm1, %v420_v6  ;;  %408 = vmatprep.mubr.msk.bf16.mxu1 %vm79_vm1, %v421_v7 }
   0xe   :  { %401 = vmatmul.mubr.msk.bf16.gmra.mxu0 %vm79_vm1, %v422_v8  ;;  %409 = vmatmul.mubr.msk.bf16.gmra.mxu1 %vm79_vm1, %v423_v9 }
  0xc6   :  { %v398_v10 = vpop.f32.mrf.mxu0  ;;  %v406_v11 = vpop.f32.mrf.mxu1 }
  0xc7   :  { %v151_v16 = vadd.f32 %v398_v10, %v289_v12  ;;  %v183_v19 = vadd.f32 %v406_v11, %v289_v12 }
  0xc8   :  { %v142_v13 = vpop.f32.mrf.mxu0  ;;  %v174_v14 = vpop.f32.mrf.mxu1 }
  0xc9   :  { %v143_v22 = vadd.f32 %v289_v12, %v142_v13  ;;  %v175_v26 = vadd.f32 %v289_v12, %v174_v14 }
  0xca   :  { %v399_v15 = vpop.f32.mrf.mxu0  ;;  %v407_v18 = vpop.f32.mrf.mxu1 }
  0xcb   :  { %v154_v17 = vadd.f32 %v399_v15, %v289_v12  ;;  %v186_v20 = vadd.f32 %v407_v18, %v289_v12 }
  0xcc   :  { %v145_v21 = vpop.f32.mrf.mxu0  ;;  %v177_v25 = vpop.f32.mrf.mxu1 }
  0xcd   :  { %v346_v23 = vpack.c.bf16 %v154_v17, %v151_v16  ;;  %v146_v24 = vadd.f32 %v289_v12, %v145_v21  ;;  %v366_v27 = vpack.c.bf16 %v186_v20, %v183_v19  ;;  %v178_v28 = vadd.f32 %v289_v12, %v177_v25 }
  0xce   :  { %v402_v29 = vpop.f32.mrf.mxu0  ;;  %v410_v31 = vpop.f32.mrf.mxu1 }
  0xcf   :  { %378 = vst [vmem:[%s509_s3 + $0x8] sm:$0xff] %v346_v23   ;;  %v341_v30 = vpack.c.bf16 %v146_v24, %v143_v22  ;;  %382 = vst [vmem:[%s509_s3 + $0x28] sm:$0xff] %v366_v27   ;;  %v361_v32 = vpack.c.bf16 %v178_v28, %v175_v26  ;;  %v167_v36 = vadd.f32 %v402_v29, %v289_v12 }
  0xd0   :  { %v158_v33 = vpop.f32.mrf.mxu0  ;;  %v190_v34 = vpop.f32.mrf.mxu1  ;;  %v199_v39 = vadd.f32 %v410_v31, %v289_v12 }
  0xd1   :  { %342 = vst [vmem:[%s509_s3] sm:$0xff] %v341_v30   ;;  %381 = vst [vmem:[%s509_s3 + $0x20] sm:$0xff] %v361_v32   ;;  %v159_v42 = vadd.f32 %v289_v12, %v158_v33  ;;  %v191_v46 = vadd.f32 %v289_v12, %v190_v34 }
  0xd2   :  { %v403_v35 = vpop.f32.mrf.mxu0  ;;  %v411_v38 = vpop.f32.mrf.mxu1 }
  0xd3   :  { %v170_v37 = vadd.f32 %v403_v35, %v289_v12  ;;  %v202_v40 = vadd.f32 %v411_v38, %v289_v12 }
  0xd4   :  { %v161_v41 = vpop.f32.mrf.mxu0  ;;  %v193_v45 = vpop.f32.mrf.mxu1 }
  0xd5   :  { %v356_v43 = vpack.c.bf16 %v170_v37, %v167_v36  ;;  %v162_v44 = vadd.f32 %v289_v12, %v161_v41  ;;  %v376_v47 = vpack.c.bf16 %v202_v40, %v199_v39  ;;  %v194_v48 = vadd.f32 %v289_v12, %v193_v45 }
  0xd7   :  { %380 = vst [vmem:[%s509_s3 + $0x18] sm:$0xff] %v356_v43   ;;  %v351_v49 = vpack.c.bf16 %v162_v44, %v159_v42  ;;  %384 = vst [vmem:[%s509_s3 + $0x38] sm:$0xff] %v376_v47   ;;  %v371_v50 = vpack.c.bf16 %v194_v48, %v191_v46 }
  0xd9   :  { %379 = vst [vmem:[%s509_s3 + $0x10] sm:$0xff] %v351_v49   ;;  %383 = vst [vmem:[%s509_s3 + $0x30] sm:$0xff] %v371_v50  }

</bundles_post_ra>
